<compile_context>
chip_gen: v7x
topology: tpu7x:2x2x1
jax: 0.10.0
libtpu: 0.0.40
codegen_flags: <defaults>
</compile_context>

<pallas_src>
import functools

import jax
import jax.numpy as jnp
from jax.experimental import pallas as pl
from jax.experimental.pallas import tpu as pltpu

IN_DIM = 784
OUT_DIM = 10
HID_PAD = 128            # lane-dense width for hidden layers
OUT_PAD = 16             # narrow padded output width (>= 10)
LAYER_DIMS = [(784, 64), (64, 32), (32, 16), (16, 10)]   # (fan_in, fan_out)
PAD_IN = [IN_DIM, HID_PAD, HID_PAD, HID_PAD]
PAD_OUT = [HID_PAD, HID_PAD, HID_PAD, OUT_PAD]


def _batch_tile_map(i):
    return (i, 0)


def _replicated_map(i):
    return (0, 0)


def mlp_kernel(x_ref, w1_ref, b1_ref, w2_ref, b2_ref,
               w3_ref, b3_ref, w4_ref, b4_ref, o_ref):
    # x_ref: (TB, 784) f32 ; w*: bf16 padded ; b*: f32 ; o_ref: (TB, 16) f32
    x = x_ref[...].astype(jnp.bfloat16)            # in-kernel cast (VPU, hidden under DMA)
    # Layer 1: (TB,784) @ (784,128), f32 accumulation, bias+ReLU in f32
    h = jnp.dot(x, w1_ref[...], preferred_element_type=jnp.float32)
    h = jnp.maximum(h + b1_ref[...], 0.0).astype(jnp.bfloat16)
    # Layer 2: (TB,128) @ (128,128)
    h = jnp.dot(h, w2_ref[...], preferred_element_type=jnp.float32)
    h = jnp.maximum(h + b2_ref[...], 0.0).astype(jnp.bfloat16)
    # Layer 3: (TB,128) @ (128,128)
    h = jnp.dot(h, w3_ref[...], preferred_element_type=jnp.float32)
    h = jnp.maximum(h + b3_ref[...], 0.0).astype(jnp.bfloat16)
    # Layer 4: (TB,128) @ (128,16)  -> narrow f32 logits (padded lanes stay 0)
    y = jnp.dot(h, w4_ref[...], preferred_element_type=jnp.float32)
    o_ref[...] = (y + b4_ref[...]).astype(o_ref.dtype)


def pack_params(params):
    """Zero-pad weights/biases to on-chip widths; weights bf16, biases f32.

    Zero padding is exact: padded input lanes hit zero weight rows, padded
    output lanes get zero weight columns + zero bias (ReLU(0) = 0).
    """
    packed = []
    for i, (fin, fout) in enumerate(LAYER_DIMS, start=1):
        fin_p, fout_p = PAD_IN[i - 1], PAD_OUT[i - 1]
        w = jnp.zeros((fin_p, fout_p), jnp.float32).at[:fin, :fout].set(params[f"w{i}"])
        b = jnp.zeros((1, fout_p), jnp.float32).at[:, :fout].set(params[f"b{i}"])
        packed.append(w.astype(jnp.bfloat16))
        packed.append(b)                    # bias stays f32 (added post-accumulation)
    return tuple(packed)


@functools.partial(jax.jit, static_argnames=("tb",))
def mlp_forward(x, params, *, tb=2048):
    """x: (B, 784) float32. params: dict w1..w4 (in,out) f32, b1..b4 (1,out) f32."""
    B = x.shape[0]

    # --- batch tile selection (no padded copy of x) ---------------------------
    n_tiles = pl.cdiv(B, tb)
    if n_tiles == 1 and B >= 1024:
        n_tiles = 2                          # give both v7x TensorCores a tile
    TB = max(8, ((pl.cdiv(B, n_tiles) + 7) // 8) * 8)   # multiple of 8 sublanes
    grid = (pl.cdiv(B, TB),)                 # ragged last tile masked by Pallas

    packed = pack_params(params)             # (w1,b1,w2,b2,w3,b3,w4,b4)

    in_specs = [pl.BlockSpec((TB, IN_DIM), _batch_tile_map)]
    in_specs += [pl.BlockSpec(p.shape, _replicated_map) for p in packed]
    out_specs = pl.BlockSpec((TB, OUT_PAD), _batch_tile_map)

    # Advisory cost hint: traffic dominated by the f32 x read.
    flops = 2 * B * (IN_DIM * HID_PAD + 2 * HID_PAD * HID_PAD + HID_PAD * OUT_PAD)
    weight_bytes = sum(int(p.size) * p.dtype.itemsize for p in packed)
    bytes_accessed = x.size * 4 + weight_bytes + B * OUT_PAD * 4
    cost = pl.CostEstimate(flops=flops, transcendentals=0,
                           bytes_accessed=bytes_accessed)

    # VMEM: double-buffered x tile + double-buffered output tile + weights + margin.
    vmem_need = (2 * TB * IN_DIM * 4 + 2 * TB * OUT_PAD * 4
                 + 2 * weight_bytes + (4 << 20))
    vmem_limit = int(max(vmem_need, 16 << 20))

    out = pl.pallas_call(
        mlp_kernel,
        out_shape=jax.ShapeDtypeStruct((B, OUT_PAD), jnp.float32),
        grid=grid,
        in_specs=in_specs,
        out_specs=out_specs,
        compiler_params=pltpu.CompilerParams(
            dimension_semantics=("parallel",),
            vmem_limit_bytes=vmem_limit,
        ),
        cost_estimate=cost,
    )(x, *packed)

    return out[:, :OUT_DIM]


def init_params(key):
    """PyTorch nn.Linear default init: U(-1/sqrt(fan_in), 1/sqrt(fan_in)).
    Stored as (in, out) so the kernel computes x @ W + b."""
    params = {}
    for i, (fin, fout) in enumerate(LAYER_DIMS, start=1):
        key, kw, kb = jax.random.split(key, 3)
        bound = 1.0 / (fin ** 0.5)
        params[f"w{i}"] = jax.random.uniform(
            kw, (fin, fout), jnp.float32, minval=-bound, maxval=bound)
        params[f"b{i}"] = jax.random.uniform(
            kb, (1, fout), jnp.float32, minval=-bound, maxval=bound)
    return params


def reference_forward(x, params):
    """Plain-JAX reference mirroring the kernel's dtype chain (bf16 inputs /
    weights, f32 accumulation + bias, bf16 intermediates, f32 logits)."""
    h = x.astype(jnp.bfloat16)
    y = None
    for i in range(1, 5):
        w = params[f"w{i}"].astype(jnp.bfloat16)
        b = params[f"b{i}"]
        y = jnp.dot(h, w, preferred_element_type=jnp.float32) + b
        if i < 4:
            h = jnp.maximum(y, 0.0).astype(jnp.bfloat16)
    return y


if __name__ == "__main__":
    key = jax.random.PRNGKey(0)
    kx, kp = jax.random.split(key)
    B = 8  # small demo batch; MNIST flattened input is 784
    x = jax.random.normal(kx, (B, 784), dtype=jnp.float32)
    params = init_params(kp)

    y = mlp_forward(x, params)
    y = jax.block_until_ready(y)

    y_ref = reference_forward(x, params)
    assert y.shape == (B, 10)
    assert jnp.allclose(y, y_ref, atol=1e-2, rtol=1e-2), (
        float(jnp.max(jnp.abs(y - y_ref))))

    print("KERNEL_OK")
</pallas_src>

<mosaic_0001>
module attributes {stable_mosaic.version = 11 : i64} {
  func.func @mlp_kernel(%arg0: i32, %arg1: memref<8x784xf32, #tpu.memory_space<vmem>>, %arg2: memref<784x128xbf16, #tpu.memory_space<vmem>>, %arg3: memref<1x128xf32, #tpu.memory_space<vmem>>, %arg4: memref<128x128xbf16, #tpu.memory_space<vmem>>, %arg5: memref<1x128xf32, #tpu.memory_space<vmem>>, %arg6: memref<128x128xbf16, #tpu.memory_space<vmem>>, %arg7: memref<1x128xf32, #tpu.memory_space<vmem>>, %arg8: memref<128x16xbf16, #tpu.memory_space<vmem>>, %arg9: memref<1x16xf32, #tpu.memory_space<vmem>>, %arg10: memref<8x16xf32, #tpu.memory_space<vmem>>) attributes {dimension_semantics = [#tpu.dimension_semantics<parallel>], iteration_bounds = array<i64: 1>, scalar_prefetch = 0 : i64, scratch_operands = 0 : i64, tpu.core_type = #tpu.core_type<tc>, window_params = [{transform_indices = @transform_0, window_bounds = array<i64: 8, 784>}, {pipeline_mode = #tpu.pipeline_mode<synchronous>, transform_indices = @transform_1, window_bounds = array<i64: 784, 128>}, {pipeline_mode = #tpu.pipeline_mode<synchronous>, transform_indices = @transform_2, window_bounds = array<i64: 1, 128>}, {pipeline_mode = #tpu.pipeline_mode<synchronous>, transform_indices = @transform_3, window_bounds = array<i64: 128, 128>}, {pipeline_mode = #tpu.pipeline_mode<synchronous>, transform_indices = @transform_4, window_bounds = array<i64: 1, 128>}, {pipeline_mode = #tpu.pipeline_mode<synchronous>, transform_indices = @transform_5, window_bounds = array<i64: 128, 128>}, {pipeline_mode = #tpu.pipeline_mode<synchronous>, transform_indices = @transform_6, window_bounds = array<i64: 1, 128>}, {pipeline_mode = #tpu.pipeline_mode<synchronous>, transform_indices = @transform_7, window_bounds = array<i64: 128, 16>}, {pipeline_mode = #tpu.pipeline_mode<synchronous>, transform_indices = @transform_8, window_bounds = array<i64: 1, 16>}, {transform_indices = @transform_9, window_bounds = array<i64: 8, 16>}]} {
    %c0 = arith.constant 0 : index
    %c0_0 = arith.constant 0 : index
    %0 = vector.load %arg1[%c0, %c0_0] : memref<8x784xf32, #tpu.memory_space<vmem>>, vector<8x784xf32>
    %1 = arith.truncf %0 : vector<8x784xf32> to vector<8x784xbf16>
    %c0_1 = arith.constant 0 : index
    %c0_2 = arith.constant 0 : index
    %2 = vector.load %arg2[%c0_1, %c0_2] : memref<784x128xbf16, #tpu.memory_space<vmem>>, vector<784x128xbf16>
    %cst = arith.constant dense<0.000000e+00> : vector<8x128xf32>
    %3 = tpu.matmul %1, %2, %cst {dimension_numbers = #tpu.dot_dimension_numbers<[1], [0], [0], [1], [0, 0, 1, 1], [], []>} : vector<8x784xbf16>, vector<784x128xbf16>, vector<8x128xf32> -> vector<8x128xf32>
    %c0_3 = arith.constant 0 : index
    %c0_4 = arith.constant 0 : index
    %4 = vector.load %arg3[%c0_3, %c0_4] : memref<1x128xf32, #tpu.memory_space<vmem>>, vector<1x128xf32>
    %5 = vector.broadcast %4 : vector<1x128xf32> to vector<8x128xf32>
    %6 = arith.addf %3, %5 : vector<8x128xf32>
    %cst_5 = arith.constant 0.000000e+00 : f32
    %7 = vector.broadcast %cst_5 : f32 to vector<8x128xf32>
    %8 = arith.maximumf %6, %7 : vector<8x128xf32>
    %9 = arith.truncf %8 : vector<8x128xf32> to vector<8x128xbf16>
    %c0_6 = arith.constant 0 : index
    %c0_7 = arith.constant 0 : index
    %10 = vector.load %arg4[%c0_6, %c0_7] : memref<128x128xbf16, #tpu.memory_space<vmem>>, vector<128x128xbf16>
    %cst_8 = arith.constant dense<0.000000e+00> : vector<8x128xf32>
    %11 = tpu.matmul %9, %10, %cst_8 {dimension_numbers = #tpu.dot_dimension_numbers<[1], [0], [0], [1], [0, 0, 1, 1], [], []>} : vector<8x128xbf16>, vector<128x128xbf16>, vector<8x128xf32> -> vector<8x128xf32>
    %c0_9 = arith.constant 0 : index
    %c0_10 = arith.constant 0 : index
    %12 = vector.load %arg5[%c0_9, %c0_10] : memref<1x128xf32, #tpu.memory_space<vmem>>, vector<1x128xf32>
    %13 = vector.broadcast %12 : vector<1x128xf32> to vector<8x128xf32>
    %14 = arith.addf %11, %13 : vector<8x128xf32>
    %cst_11 = arith.constant 0.000000e+00 : f32
    %15 = vector.broadcast %cst_11 : f32 to vector<8x128xf32>
    %16 = arith.maximumf %14, %15 : vector<8x128xf32>
    %17 = arith.truncf %16 : vector<8x128xf32> to vector<8x128xbf16>
    %c0_12 = arith.constant 0 : index
    %c0_13 = arith.constant 0 : index
    %18 = vector.load %arg6[%c0_12, %c0_13] : memref<128x128xbf16, #tpu.memory_space<vmem>>, vector<128x128xbf16>
    %cst_14 = arith.constant dense<0.000000e+00> : vector<8x128xf32>
    %19 = tpu.matmul %17, %18, %cst_14 {dimension_numbers = #tpu.dot_dimension_numbers<[1], [0], [0], [1], [0, 0, 1, 1], [], []>} : vector<8x128xbf16>, vector<128x128xbf16>, vector<8x128xf32> -> vector<8x128xf32>
    %c0_15 = arith.constant 0 : index
    %c0_16 = arith.constant 0 : index
    %20 = vector.load %arg7[%c0_15, %c0_16] : memref<1x128xf32, #tpu.memory_space<vmem>>, vector<1x128xf32>
    %21 = vector.broadcast %20 : vector<1x128xf32> to vector<8x128xf32>
    %22 = arith.addf %19, %21 : vector<8x128xf32>
    %cst_17 = arith.constant 0.000000e+00 : f32
    %23 = vector.broadcast %cst_17 : f32 to vector<8x128xf32>
    %24 = arith.maximumf %22, %23 : vector<8x128xf32>
    %25 = arith.truncf %24 : vector<8x128xf32> to vector<8x128xbf16>
    %c0_18 = arith.constant 0 : index
    %c0_19 = arith.constant 0 : index
    %26 = vector.load %arg8[%c0_18, %c0_19] : memref<128x16xbf16, #tpu.memory_space<vmem>>, vector<128x16xbf16>
    %cst_20 = arith.constant dense<0.000000e+00> : vector<8x16xf32>
    %27 = tpu.matmul %25, %26, %cst_20 {dimension_numbers = #tpu.dot_dimension_numbers<[1], [0], [0], [1], [0, 0, 1, 1], [], []>} : vector<8x128xbf16>, vector<128x16xbf16>, vector<8x16xf32> -> vector<8x16xf32>
    %c0_21 = arith.constant 0 : index
    %c0_22 = arith.constant 0 : index
    %28 = vector.load %arg9[%c0_21, %c0_22] : memref<1x16xf32, #tpu.memory_space<vmem>>, vector<1x16xf32>
    %29 = vector.broadcast %28 : vector<1x16xf32> to vector<8x16xf32>
    %30 = arith.addf %27, %29 : vector<8x16xf32>
    %c0_23 = arith.constant 0 : index
    %c0_24 = arith.constant 0 : index
    %31 = vector.load %arg10[%c0_23, %c0_24] : memref<8x16xf32, #tpu.memory_space<vmem>>, vector<8x16xf32>
    tpu.vector_store %arg10[%c0_23, %c0_24], %30 {strides = array<i32>} : memref<8x16xf32, #tpu.memory_space<vmem>>, vector<8x16xf32>,
    return
  }
  func.func @transform_0(%arg0: i32) -> (i32, i32) {
    %c0_i32 = arith.constant 0 : i32
    %c0_i32_0 = arith.constant 0 : i32
    return %arg0, %c0_i32 : i32, i32
  }
  func.func @transform_1(%arg0: i32) -> (i32, i32) {
    %c0_i32 = arith.constant 0 : i32
    %c0_i32_0 = arith.constant 0 : i32
    %c0_i32_1 = arith.constant 0 : i32
    return %c0_i32, %c0_i32_0 : i32, i32
  }
  func.func @transform_2(%arg0: i32) -> (i32, i32) {
    %c0_i32 = arith.constant 0 : i32
    %c0_i32_0 = arith.constant 0 : i32
    %c0_i32_1 = arith.constant 0 : i32
    return %c0_i32, %c0_i32_0 : i32, i32
  }
  func.func @transform_3(%arg0: i32) -> (i32, i32) {
    %c0_i32 = arith.constant 0 : i32
    %c0_i32_0 = arith.constant 0 : i32
    %c0_i32_1 = arith.constant 0 : i32
    return %c0_i32, %c0_i32_0 : i32, i32
  }
  func.func @transform_4(%arg0: i32) -> (i32, i32) {
    %c0_i32 = arith.constant 0 : i32
    %c0_i32_0 = arith.constant 0 : i32
    %c0_i32_1 = arith.constant 0 : i32
    return %c0_i32, %c0_i32_0 : i32, i32
  }
  func.func @transform_5(%arg0: i32) -> (i32, i32) {
    %c0_i32 = arith.constant 0 : i32
    %c0_i32_0 = arith.constant 0 : i32
    %c0_i32_1 = arith.constant 0 : i32
    return %c0_i32, %c0_i32_0 : i32, i32
  }
  func.func @transform_6(%arg0: i32) -> (i32, i32) {
    %c0_i32 = arith.constant 0 : i32
    %c0_i32_0 = arith.constant 0 : i32
    %c0_i32_1 = arith.constant 0 : i32
    return %c0_i32, %c0_i32_0 : i32, i32
  }
  func.func @transform_7(%arg0: i32) -> (i32, i32) {
    %c0_i32 = arith.constant 0 : i32
    %c0_i32_0 = arith.constant 0 : i32
    %c0_i32_1 = arith.constant 0 : i32
    return %c0_i32, %c0_i32_0 : i32, i32
  }
  func.func @transform_8(%arg0: i32) -> (i32, i32) {
    %c0_i32 = arith.constant 0 : i32
    %c0_i32_0 = arith.constant 0 : i32
    %c0_i32_1 = arith.constant 0 : i32
    return %c0_i32, %c0_i32_0 : i32, i32
  }
  func.func @transform_9(%arg0: i32) -> (i32, i32) {
    %c0_i32 = arith.constant 0 : i32
    %c0_i32_0 = arith.constant 0 : i32
    return %arg0, %c0_i32 : i32, i32
  }
}

</mosaic_0001>

<bundles_post_ra>
// kernel: mlp_forward.1
= control target key start
LH: loop header
LB: loop body
LE: loop exit
PB: predicated region body
PF: predicated region fallthrough
CT: control target
= control target key end

     0   :  { %v1304_v44 = vmov 0.0   ;;  %vm1305_vm0 = vmmov 0   ;;  %vm447_vm1 = vcmask 130048   ;;  %s1656_s0 = inlined_call_operand.vmem [shape: f32[8,784], index: 0, kind: input, shape index: {}]   ;;  %s1657_s1 = inlined_call_operand.vmem [shape: bf16[784,128], index: 1, kind: input, shape index: {}]   ;;  %s1658_s2 = inlined_call_operand.vmem [shape: f32[1,128], index: 2, kind: input, shape index: {}]   ;;  %s1659_s3 = inlined_call_operand.vmem [shape: bf16[128,128], index: 3, kind: input, shape index: {}]   ;;  %s1660_s4 = inlined_call_operand.vmem [shape: f32[1,128], index: 4, kind: input, shape index: {}]   ;;  %s1661_s5 = inlined_call_operand.vmem [shape: bf16[128,128], index: 5, kind: input, shape index: {}]   ;;  %s1662_s6 = inlined_call_operand.vmem [shape: f32[1,128], index: 6, kind: input, shape index: {}]   ;;  %s1663_s7 = inlined_call_operand.vmem [shape: bf16[128,16], index: 7, kind: input, shape index: {}]   ;;  %s1664_s8 = inlined_call_operand.vmem [shape: f32[1,16], index: 8, kind: input, shape index: {}]   ;;  %s1665_s9 = inlined_call_operand.hbm [shape: f32[8,16], index: 9, kind: output, shape index: {}]  }
   0x1   :  { %v1207_v0 = vld [vmem:[%s1657_s1 + $0x40] sm:$0xff]   ;;  %v1211_v4 = vld [vmem:[%s1657_s1 + $0x48] sm:$0xff]   ;;  %v1215_v8 = vld [vmem:[%s1657_s1 + $0x50] sm:$0xff]  }
   0x2   :  { %v1208_v1 = vld [vmem:[%s1657_s1] sm:$0xff]   ;;  %1043 = vmatprep.subr.bf16.mxu0 %v1207_v0  ;;  %v1212_v5 = vld [vmem:[%s1657_s1 + $0x8] sm:$0xff]   ;;  %v1216_v9 = vld [vmem:[%s1657_s1 + $0x10] sm:$0xff]  }
   0x3   :  { %v1209_v2 = vld [vmem:[%s1657_s1 + $0xc0] sm:$0xff]   ;;  %1044 = vmatpush3.bf16.msra.mxu0 %v1208_v1  ;;  %v1213_v6 = vld [vmem:[%s1657_s1 + $0xc8] sm:$0xff]   ;;  %v1217_v10 = vld [vmem:[%s1657_s1 + $0xd0] sm:$0xff]  }
   0x4   :  { %v1210_v3 = vld [vmem:[%s1657_s1 + $0x80] sm:$0xff]   ;;  %1065 = vmatprep.subr.bf16.mxu1 %v1209_v2  ;;  %1045 = vmatprep.subr.bf16.mxu0 %v1211_v4  ;;  %v1214_v7 = vld [vmem:[%s1657_s1 + $0x88] sm:$0xff]   ;;  %v1218_v11 = vld [vmem:[%s1657_s1 + $0x90] sm:$0xff]  }
   0x5   :  { %1066 = vmatpush3.bf16.msra.mxu1 %v1210_v3  ;;  %v1219_v12 = vld [vmem:[%s1657_s1 + $0x58] sm:$0xff]   ;;  %v1223_v16 = vld [vmem:[%s1657_s1 + $0x60] sm:$0xff]   ;;  %v1227_v20 = vld [vmem:[%s1657_s1 + $0x68] sm:$0xff]  }
   0x6   :  { %1067 = vmatprep.subr.bf16.mxu1 %v1213_v6  ;;  %v1220_v13 = vld [vmem:[%s1657_s1 + $0x18] sm:$0xff]   ;;  %v1224_v17 = vld [vmem:[%s1657_s1 + $0x20] sm:$0xff]   ;;  %v1228_v21 = vld [vmem:[%s1657_s1 + $0x28] sm:$0xff]  }
   0x7   :  { %1046 = vmatpush3.bf16.msra.mxu0 %v1212_v5  ;;  %v1221_v14 = vld [vmem:[%s1657_s1 + $0xd8] sm:$0xff]   ;;  %v1225_v18 = vld [vmem:[%s1657_s1 + $0xe0] sm:$0xff]   ;;  %v1229_v22 = vld [vmem:[%s1657_s1 + $0xe8] sm:$0xff]  }
   0x8   :  { %1047 = vmatprep.subr.bf16.mxu0 %v1215_v8  ;;  %v1222_v15 = vld [vmem:[%s1657_s1 + $0x98] sm:$0xff]   ;;  %v1226_v19 = vld [vmem:[%s1657_s1 + $0xa0] sm:$0xff]   ;;  %v1230_v23 = vld [vmem:[%s1657_s1 + $0xa8] sm:$0xff]  }
   0x9   :  { %1068 = vmatpush3.bf16.msra.mxu1 %v1214_v7  ;;  %v1231_v24 = vld [vmem:[%s1657_s1 + $0x70] sm:$0xff]   ;;  %v1235_v28 = vld [vmem:[%s1657_s1 + $0x78] sm:$0xff]   ;;  %v35_v31 = vld [vmem:[%s1656_s0 + $0x8] sm:$0xff] }
   0xa   :  { %1069 = vmatprep.subr.bf16.mxu1 %v1217_v10  ;;  %v1232_v25 = vld [vmem:[%s1657_s1 + $0x30] sm:$0xff]   ;;  %v1236_v29 = vld [vmem:[%s1657_s1 + $0x38] sm:$0xff]   ;;  %v42_v32 = vpack.c.bf16 %v35_v31, %v35_v31  ;;  %v34_v34 = vld [vmem:[%s1656_s0] sm:$0xff] }
   0xb   :  { %1048 = vmatpush3.bf16.msra.mxu0 %v1216_v9  ;;  %v1233_v26 = vld [vmem:[%s1657_s1 + $0xf0] sm:$0xff]   ;;  %v1237_v30 = vld [vmem:[%s1657_s1 + $0xf8] sm:$0xff]   ;;  %v41_v35 = vpack.c.bf16 %v34_v34, %v34_v34  ;;  %v1239_v36 = vld [vmem:[%s1657_s1 + $0x140] sm:$0xff]  }
   0xc   :  { %1049 = vmatprep.subr.bf16.mxu0 %v1219_v12  ;;  %v1234_v27 = vld [vmem:[%s1657_s1 + $0xb0] sm:$0xff]   ;;  %v1238_v33 = vld [vmem:[%s1657_s1 + $0xb8] sm:$0xff]   ;;  %483 = vmatprep.mubr.bf16.mxu0 %v42_v32  ;;  %v1240_v39 = vld [vmem:[%s1657_s1 + $0x100] sm:$0xff]  }
   0xd   :  { %1070 = vmatpush3.bf16.msra.mxu1 %v1218_v11  ;;  %v37_v37 = vld [vmem:[%s1656_s0 + $0x18] sm:$0xff]  ;;  %v36_v40 = vld [vmem:[%s1656_s0 + $0x10] sm:$0xff]  ;;  %v1241_v42 = vld [vmem:[%s1657_s1 + $0x148] sm:$0xff]  }
   0xe   :  { %1071 = vmatprep.subr.bf16.mxu1 %v1221_v14  ;;  %v44_v38 = vpack.c.bf16 %v37_v37, %v37_v37  ;;  %v43_v41 = vpack.c.bf16 %v36_v40, %v36_v40  ;;  %v1242_v43 = vld [vmem:[%s1657_s1 + $0x108] sm:$0xff]   ;;  %v1243_v45 = vld [vmem:[%s1657_s1 + $0x150] sm:$0xff]   ;;  %v1245_v47 = vld [vmem:[%s1657_s1 + $0x158] sm:$0xff]  }
   0xf   :  { %1050 = vmatpush3.bf16.msra.mxu0 %v1220_v13  ;;  %v1244_v46 = vld [vmem:[%s1657_s1 + $0x110] sm:$0xff]   ;;  %v1246_v48 = vld [vmem:[%s1657_s1 + $0x118] sm:$0xff]   ;;  %v1247_v49 = vld [vmem:[%s1657_s1 + $0x160] sm:$0xff]  }
  0x10   :  { %1051 = vmatprep.subr.bf16.mxu0 %v1223_v16  ;;  %523 = vmatprep.mubr.bf16.mxu1 %v44_v38  ;;  %v1248_v50 = vld [vmem:[%s1657_s1 + $0x120] sm:$0xff]   ;;  %v1249_v51 = vld [vmem:[%s1657_s1 + $0x168] sm:$0xff]   ;;  %v1251_v55 = vld [vmem:[%s1657_s1 + $0x170] sm:$0xff]  }
  0x11   :  { %1072 = vmatpush3.bf16.msra.mxu1 %v1222_v15  ;;  %v1250_v52 = vld [vmem:[%s1657_s1 + $0x128] sm:$0xff]   ;;  %v1255_v53 = vld [vmem:[%s1657_s1 + $0x180] sm:$0xff]   ;;  %v40_v57 = vld [vmem:[%s1656_s0 + $0x30] sm:$0xff] }
  0x12   :  { %1073 = vmatprep.subr.bf16.mxu1 %v1225_v18  ;;  %v39_v54 = vld [vmem:[%s1656_s0 + $0x28] sm:$0xff]  ;;  %v47_v58 = vpack.c.bf16 %v40_v57, %v40_v57  ;;  %v1252_v59 = vld [vmem:[%s1657_s1 + $0x130] sm:$0xff]   ;;  %v1253_v60 = vld [vmem:[%s1657_s1 + $0x178] sm:$0xff]  }
  0x13   :  { %1052 = vmatpush3.bf16.msra.mxu0 %v1224_v17  ;;  %v46_v56 = vpack.c.bf16 %v39_v54, %v39_v54  ;;  %v1254_v61 = vld [vmem:[%s1657_s1 + $0x138] sm:$0xff]   ;;  %v38_v62 = vld [vmem:[%s1656_s0 + $0x20] sm:$0xff] }
  0x14   :  { %1053 = vmatprep.subr.bf16.mxu0 %v1227_v20  ;;  %v45_v63 = vpack.c.bf16 %v38_v62, %v38_v62 }
  0x15   :  { %1074 = vmatpush3.bf16.msra.mxu1 %v1226_v19 }
  0x16   :  { %1075 = vmatprep.subr.bf16.mxu1 %v1229_v22 }
  0x17   :  { %1054 = vmatpush3.bf16.msra.mxu0 %v1228_v21 }
  0x18   :  { %1055 = vmatprep.subr.bf16.mxu0 %v1231_v24 }
  0x19   :  { %1076 = vmatpush3.bf16.msra.mxu1 %v1230_v23 }
  0x1a   :  { %1077 = vmatprep.subr.bf16.mxu1 %v1233_v26 }
  0x1b   :  { %1056 = vmatpush3.bf16.msra.mxu0 %v1232_v25 }
  0x1c   :  { %1057 = vmatprep.subr.bf16.mxu0 %v1235_v28 }
  0x1d   :  { %1078 = vmatpush3.bf16.msra.mxu1 %v1234_v27 }
  0x1e   :  { %1079 = vmatprep.subr.bf16.mxu1 %v1237_v30 }
  0x1f   :  { %1058 = vmatpush3.bf16.msra.mxu0 %v1236_v29 }
  0x20   :  { %1087 = vmatprep.subr.bf16.mxu0 %v1239_v36 }
  0x21   :  { %1080 = vmatpush3.bf16.msra.mxu1 %v1238_v33 }
  0x22   :  { %484 = vmatmul.mubr.bf16.vlgmr.msra.gmra.mrb[0].mxu0 %v41_v35  ;;  %1138 = vmatprep.subr.bf16.mxu1 %v1304_v44 }
  0x23   :  { %1088 = vmatpush3.bf16.msra.mxu0 %v1240_v39  ;;  %563 = vmatprep.mubr.bf16.mxu0 %v46_v56 }
  0x24   :  { %524 = vmatmul.mubr.bf16.vlgmr.msra.gmra.mrb[0].mxu1 %v43_v41  ;;  %1089 = vmatprep.subr.bf16.mxu0 %v1241_v42 }
  0x25   :  { %1140 = vmatprep.mubr.msk.bf16.mxu1 %vm1305_vm0, %v1304_v44  ;;  %1139 = vmatpush3.bf16.msra.mxu1 %v1255_v53 }
  0x26   :  { %1144 = vmatprep.subr.bf16.mxu1 %v1304_v44 }
  0x27   :  { %1090 = vmatpush3.bf16.msra.mxu0 %v1242_v43 }
  0x28   :  { %1091 = vmatprep.subr.bf16.mxu0 %v1243_v45 }
  0x2b   :  { %1092 = vmatpush3.bf16.msra.mxu0 %v1244_v46 }
  0x2c   :  { %1093 = vmatprep.subr.bf16.mxu0 %v1245_v47  ;;  %1141 = vmatmul.mubr.msk.bf16.vlgmr.msra.gmra.mrb[4].mxu1 %vm447_vm1, %v47_v58 }
  0x2d   :  { %1160 = vmatprep.mubr.msk.bf16.mxu1 %vm1305_vm0, %v1304_v44 }
  0x2f   :  { %1094 = vmatpush3.bf16.msra.mxu0 %v1246_v48 }
  0x30   :  { %1095 = vmatprep.subr.bf16.mxu0 %v1247_v49 }
  0x33   :  { %1096 = vmatpush3.bf16.msra.mxu0 %v1248_v50 }
  0x34   :  { %1097 = vmatprep.subr.bf16.mxu0 %v1249_v51 }
  0x37   :  { %1098 = vmatpush3.bf16.msra.mxu0 %v1250_v52 }
  0x38   :  { %1099 = vmatprep.subr.bf16.mxu0 %v1251_v55 }
  0x3b   :  { %1100 = vmatpush3.bf16.msra.mxu0 %v1252_v59 }
  0x3c   :  { %1101 = vmatprep.subr.bf16.mxu0 %v1253_v60 }
  0x3f   :  { %1102 = vmatpush3.bf16.msra.mxu0 %v1254_v61 }
  0x40   :  { %1164 = vmatprep.subr.bf16.mxu0 %v1304_v44 }
  0x42   :  { %564 = vmatmul.mubr.bf16.vlgmr.msra.gmra.mrb[4].mxu0 %v45_v63 }
  0x43   :  { %14 = vsyncpa [#allocation3], 0  ;;  %1180 = vmatprep.mubr.msk.bf16.mxu0 %vm1305_vm0, %v1304_v44  ;;  %v1256_v0 = vld [vmem:[%s1659_s3] sm:$0xff]   ;;  %v1257_v1 = vld [vmem:[%s1659_s3 + $0x8] sm:$0xff]   ;;  %s1306_s19 = smov [#allocation2]  }
  0x44   :  { %1145 = vmatpush3.bf16.msra.mxu1 %v1256_v0  ;;  %v1258_v2 = vld [vmem:[%s1659_s3 + $0x10] sm:$0xff]   ;;  %v1259_v3 = vld [vmem:[%s1659_s3 + $0x18] sm:$0xff]   ;;  %v1260_v4 = vld [vmem:[%s1659_s3 + $0x20] sm:$0xff]  }
  0x45   :  { %1146 = vmatprep.subr.bf16.mxu1 %v1304_v44  ;;  %v1261_v5 = vld [vmem:[%s1659_s3 + $0x28] sm:$0xff]   ;;  %v1262_v6 = vld [vmem:[%s1659_s3 + $0x30] sm:$0xff]   ;;  %v1263_v7 = vld [vmem:[%s1659_s3 + $0x38] sm:$0xff]  }
  0x46   :  { %v1264_v8 = vld [vmem:[%s1661_s5] sm:$0xff]   ;;  %v1265_v9 = vld [vmem:[%s1661_s5 + $0x8] sm:$0xff]   ;;  %v1266_v10 = vld [vmem:[%s1661_s5 + $0x10] sm:$0xff]  }
  0x47   :  { %1165 = vmatpush3.bf16.msra.mxu0 %v1264_v8  ;;  %v1267_v11 = vld [vmem:[%s1661_s5 + $0x18] sm:$0xff]   ;;  %v1268_v12 = vld [vmem:[%s1661_s5 + $0x20] sm:$0xff]   ;;  %v1269_v13 = vld [vmem:[%s1661_s5 + $0x28] sm:$0xff]  }
  0x48   :  { %1147 = vmatpush3.bf16.msra.mxu1 %v1257_v1  ;;  %1166 = vmatprep.subr.bf16.mxu0 %v1304_v44  ;;  %v965_v15 = vld [vmem:[%s1658_s2] ss:$0 sm:$0xff]  ;;  %v1270_v40 = vld [vmem:[%s1661_s5 + $0x30] sm:$0xff]   ;;  %v1271_v41 = vld [vmem:[%s1661_s5 + $0x38] sm:$0xff]   ;;  %s957_s2 = sshll.u32 %s1306_s19, 4  ;;  %s958_s2 = int_to_ptr.vmem [resolvable:$true] %s957_s2 }
  0x49   :  { %1148 = vmatprep.subr.bf16.mxu1 %v1304_v44  ;;  %v1272_v42 = vld [vmem:[%s1663_s7] sm:$0xff]   ;;  %v1273_v43 = vld [vmem:[%s1663_s7 + $0x8] sm:$0xff]   ;;  %v1274_v45 = vld [vmem:[%s1663_s7 + $0x10] sm:$0xff]   ;;  %p1285_p1 = scmp.lt.s32.totalorder %s958_s2, %s958_s2 }
  0x4a   :  { %v1275_v46 = vld [vmem:[%s1663_s7 + $0x18] sm:$0xff]   ;;  %v1276_v47 = vld [vmem:[%s1663_s7 + $0x20] sm:$0xff]   ;;  %v1277_v48 = vld [vmem:[%s1663_s7 + $0x28] sm:$0xff]  }
  0x4b   :  { %1167 = vmatpush3.bf16.msra.mxu0 %v1265_v9  ;;  %v1016_v49 = vld [vmem:[%s1660_s4] ss:$0 sm:$0xff]  ;;  %v1278_v57 = vld [vmem:[%s1663_s7 + $0x30] sm:$0xff]   ;;  %v1279_v58 = vld [vmem:[%s1663_s7 + $0x38] sm:$0xff]  }
  0x4c   :  { %1149 = vmatpush3.bf16.msra.mxu1 %v1258_v2  ;;  %1168 = vmatprep.subr.bf16.mxu0 %v1304_v44  ;;  %v1025_v59 = vld [vmem:[%s1662_s6] ss:$0 sm:$0xff]  ;;  %s1280_s6 = scalar_lea.vmem %s958_s2, 128 }
  0x4d   :  { %1150 = vmatprep.subr.bf16.mxu1 %v1304_v44  ;;  %p1281_p0 = scmp.ne.s32.totalorder %s958_s2, %s1280_s6  ;;  %p1286_p2 = scmp.lt.s32.totalorder %s1280_s6, %s1280_s6 }
  0x4f   :  { %1169 = vmatpush3.bf16.msra.mxu0 %v1266_v10  ;;  %p1287_p3 = por %p1286_p2, %p1285_p1 }
  0x50   :  { %1151 = vmatpush3.bf16.msra.mxu1 %v1259_v3  ;;  %1170 = vmatprep.subr.bf16.mxu0 %v1304_v44 }
  0x51   :  { %1152 = vmatprep.subr.bf16.mxu1 %v1304_v44  ;;  %p1288_p4 = pnand %p1287_p3, %p1281_p0 }
  0x53   :  { %1171 = vmatpush3.bf16.msra.mxu0 %v1267_v11 }
  0x54   :  { %1153 = vmatpush3.bf16.msra.mxu1 %v1260_v4  ;;  %1172 = vmatprep.subr.bf16.mxu0 %v1304_v44 }
  0x55   :  { %1154 = vmatprep.subr.bf16.mxu1 %v1304_v44 }
  0x57   :  { %1173 = vmatpush3.bf16.msra.mxu0 %v1268_v12 }
  0x58   :  { %1155 = vmatpush3.bf16.msra.mxu1 %v1261_v5  ;;  %1174 = vmatprep.subr.bf16.mxu0 %v1304_v44 }
  0x59   :  { %1156 = vmatprep.subr.bf16.mxu1 %v1304_v44 }
  0x5b   :  { %1175 = vmatpush3.bf16.msra.mxu0 %v1269_v13 }
  0x5c   :  { %1157 = vmatpush3.bf16.msra.mxu1 %v1262_v6  ;;  %1176 = vmatprep.subr.bf16.mxu0 %v1304_v44 }
  0x5d   :  { %1158 = vmatprep.subr.bf16.mxu1 %v1304_v44 }
  0x5f   :  { %1177 = vmatpush3.bf16.msra.mxu0 %v1270_v40 }
  0x60   :  { %1159 = vmatpush3.bf16.msra.mxu1 %v1263_v7  ;;  %1178 = vmatprep.subr.bf16.mxu0 %v1304_v44 }
  0x61   :  { %1184 = vmatprep.subr.bf16.mxu1 %v1304_v44 }
  0x63   :  { %1179 = vmatpush3.bf16.msra.mxu0 %v1271_v41 }
  0xf5   :  { %v1059_v14 = vpop.f32.mrb[0].mxu0 }
  0xf6   :  { %v1060_v16 = vpop.f32.mrb[1].mxu0 }
  0xf7   :  { %v1061_v17 = vadd.f32 %v1060_v16, %v1059_v14  ;;  %v1062_v18 = vpop.f32.mrb[2].mxu0  ;;  %v1081_v19 = vpop.f32.mrb[0].mxu1 }
  0xf8   :  { %v1063_v20 = vpop.f32.mrb[3].mxu0  ;;  %v1082_v22 = vpop.f32.mrb[1].mxu1 }
  0xf9   :  { %v486_v21 = vadd.f32 %v1061_v17, %v965_v15  ;;  %v1083_v23 = vadd.f32 %v1082_v22, %v1081_v19  ;;  %v1084_v24 = vpop.f32.mrb[2].mxu1 }
  0xfa   :  { %v1085_v25 = vpop.f32.mrb[3].mxu1 }
  0xfb   :  { %v526_v26 = vadd.f32 %v1083_v23, %v486_v21 }
  0xff   :  { %v605_v27 = vpop.f32.mrb[4].mxu1 }
 0x100   :  { %v1142_v28 = vpop.f32.mrb[5].mxu1 }
 0x101   :  { %v608_v29 = vpop.f32.mrb[6].mxu1 }
 0x102   :  { %v1143_v30 = vpop.f32.mrb[7].mxu1 }
 0x115   :  { %v1103_v31 = vpop.f32.mrb[4].mxu0 }
 0x116   :  { %v1104_v32 = vpop.f32.mrb[5].mxu0 }
 0x117   :  { %v1105_v33 = vadd.f32 %v1104_v32, %v1103_v31  ;;  %v1106_v34 = vpop.f32.mrb[6].mxu0 }
 0x118   :  { %v1107_v35 = vpop.f32.mrb[7].mxu0 }
 0x119   :  { %v566_v36 = vadd.f32 %v1105_v33, %v526_v26 }
 0x11b   :  { %v606_v37 = vadd.f32 %v605_v27, %v566_v36 }
 0x11d   :  { %v611_v38 = vmax.f32 %v606_v37, 0.0 }
 0x11f   :  { %v612_v39 = vpack.c.bf16 %v611_v38, %v611_v38 }
 0x121   :  { %1161 = vmatmul.mubr.bf16.vlgmr.msra.gmra.mrb[8].mxu1 %v612_v39 }
 0x122   :  { %1200 = vmatprep.mubr.msk.bf16.mxu1 %vm1305_vm0, %v1304_v44  ;;  %1185 = vmatpush3.bf16.msra.mxu1 %v1272_v42 }
 0x123   :  { %1186 = vmatprep.subr.bf16.mxu1 %v1304_v44 }
 0x126   :  { %1187 = vmatpush3.bf16.msra.mxu1 %v1273_v43 }
 0x127   :  { %1188 = vmatprep.subr.bf16.mxu1 %v1304_v44 }
 0x12a   :  { %1189 = vmatpush3.bf16.msra.mxu1 %v1274_v45 }
 0x12b   :  { %1190 = vmatprep.subr.bf16.mxu1 %v1304_v44 }
 0x12e   :  { %1191 = vmatpush3.bf16.msra.mxu1 %v1275_v46 }
 0x12f   :  { %1192 = vmatprep.subr.bf16.mxu1 %v1304_v44 }
 0x132   :  { %1193 = vmatpush3.bf16.msra.mxu1 %v1276_v47 }
 0x133   :  { %1194 = vmatprep.subr.bf16.mxu1 %v1304_v44 }
 0x136   :  { %1195 = vmatpush3.bf16.msra.mxu1 %v1277_v48 }
 0x137   :  { %1196 = vmatprep.subr.bf16.mxu1 %v1304_v44 }
 0x13a   :  { %1197 = vmatpush3.bf16.msra.mxu1 %v1278_v57 }
 0x13b   :  { %1198 = vmatprep.subr.bf16.mxu1 %v1304_v44  ;;  %v1034_v44 = vld [vmem:[%s1664_s8] ss:$0 sm:$0xff] }
 0x13e   :  { %1199 = vmatpush3.bf16.msra.mxu1 %v1279_v58 }
 0x1f4   :  { %v718_v50 = vpop.f32.mrb[8].mxu1 }
 0x1f5   :  { %v719_v51 = vadd.f32 %v1016_v49, %v718_v50  ;;  %v1162_v52 = vpop.f32.mrb[9].mxu1 }
 0x1f6   :  { %v721_v53 = vpop.f32.mrb[10].mxu1 }
 0x1f7   :  { %v724_v54 = vmax.f32 %v719_v51, 0.0  ;;  %v1163_v55 = vpop.f32.mrb[11].mxu1 }
 0x1f9   :  { %v725_v56 = vpack.c.bf16 %v724_v54, %v724_v54 }
 0x1fb   :  { %1181 = vmatmul.mubr.bf16.vlgmr.msra.gmra.mrb[8].mxu0 %v725_v56 }
 0x2ce   :  { %v831_v60 = vpop.f32.mrb[8].mxu0 }
 0x2cf   :  { %v832_v61 = vadd.f32 %v1025_v59, %v831_v60  ;;  %v1182_v62 = vpop.f32.mrb[9].mxu0 }
 0x2d0   :  { %v834_v63 = vpop.f32.mrb[10].mxu0 }
 0x2d1   :  { %v837_v0 = vmax.f32 %v832_v61, 0.0  ;;  %v1183_v1 = vpop.f32.mrb[11].mxu0 }
 0x2d3   :  { %v838_v2 = vpack.c.bf16 %v837_v0, %v837_v0 }
 0x2d5   :  { %1201 = vmatmul.mubr.bf16.vlgmr.msra.gmra.mrb[12].mxu1 %v838_v2 }
 0x3a8   :  { %v944_v3 = vpop.f32.mrb[12].mxu1 }
 0x3a9   :  { %v945_v4 = vadd.f32 %v1034_v44, %v944_v3  ;;  %v1202_v5 = vpop.f32.mrb[13].mxu1 }
 0x3aa   :  { %v947_v6 = vpop.f32.mrb[14].mxu1 }
 0x3ab   :  { %950 = vst.msk [vmem:[#allocation2] sm:$0xff] %vm447_vm1, %v945_v4  ;;  %v1203_v7 = vpop.f32.mrb[15].mxu1 }
 0x3ac   :  { %1291 = shalt.err (!%p1288_p4)
}
 0x3ad   :  { %s1292_s8 = scalar_lea.hbm %s1665_s9, 128 }
 0x3ae   :  { %p1293_p5 = scmp.ne.s32.totalorder %s1665_s9, %s1292_s8  ;;  %p1296_p6 = scmp.lt.u32.totalorder %s1292_s8, %s1665_s9 }
 0x3b0   :  { %p1298_p7 = pnand %p1296_p6, %p1293_p5 }
 0x3b2   :  { %1301 = shalt.err (!%p1298_p7)
}
 0x3b3   :  { %960 = dma.vmem_to_hbm [thread:$0]  %s958_s2, 128, %s1665_s9, [#allocation3]  }
 0x3b4   :  { %1302 = dma.done.wait [#allocation3], 128  }
 0x3b5   :  { %1303 = vsyncadd [#allocation3], 4294967168 }
 0x3b6   :  { %964 = vsyncpa [#allocation3], 1 }

</bundles_post_ra>
